<compile_context>
chip_gen: v7x
topology: tpu7x:2x2x1
jax: 0.10.0
libtpu: 0.0.40
codegen_flags: <defaults>
</compile_context>

<pallas_src>
import jax
import jax.numpy as jnp
from jax import lax
from jax.experimental import pallas as pl
from jax.experimental.pallas import tpu as pltpu


def _round_up(x, m):
    return ((x + m - 1) // m) * m


# ----------------------------- Pallas kernels -----------------------------

def make_conv_relu_pool_kernel(oh, ow, ph, pw, ksize, pstride):
    """Fused im2col-matmul + bias + ReLU + max-pool for one batch element.

    p_ref : (1, oh*ow, Kp)   im2col patch rows for this batch element
    w_ref : (Kp, OCp)        conv weights, K and OC zero-padded lane-dense
    b_ref : (1, OCp)         conv bias (zero-padded)
    o_ref : (1, ph, pw, OCp) pooled NHWC output, lane-dense channels
    act   : (oh*ow, OCp)     VMEM scratch holding the ReLU'd conv tile
    """

    def kernel(p_ref, w_ref, b_ref, o_ref, act):
        y = jnp.dot(p_ref[0], w_ref[...], preferred_element_type=jnp.float32)
        act[...] = jnp.maximum(y + b_ref[...], 0.0)

        # Vectorised 3x3/s2 max-pool: for each pooled row, combine 9 strided
        # (pw, OCp) slabs with jnp.maximum, then one lane-dense row store.
        for io in range(ph):
            m = None
            for di in range(ksize):
                base = (io * pstride + di) * ow      # conv row of window row
                for dj in range(ksize):
                    v = act[pl.ds(base + dj, pw, pstride), :]   # (pw, OCp)
                    m = v if m is None else jnp.maximum(m, v)
            o_ref[0, io] = m

    return kernel


def linear_kernel(x_ref, w_ref, b_ref, o_ref):
    """Classifier matmul + bias.  x:(B,F) w:(F,NCp) b:(1,NCp) o:(B,NCp)."""
    o_ref[...] = (jnp.dot(x_ref[...], w_ref[...],
                          preferred_element_type=jnp.float32) + b_ref[...])


# ------------------------------- JAX glue ----------------------------------

def im2col_nchw(x, kh, kw, stride, pad):
    """Conv patches, channel-major columns (matches PyTorch weight.reshape)."""
    # TODO(synk): move patch gathering into the kernel (DMA the padded input
    # tile to VMEM and assemble (tm, K) rows there) to avoid materialising the
    # (B, M, K) patch matrix in HBM at real AlexNet sizes.
    B, C, H, W = x.shape
    xp = jnp.pad(x, ((0, 0), (0, 0), (pad, pad), (pad, pad)))
    oh = (H + 2 * pad - kh) // stride + 1
    ow = (W + 2 * pad - kw) // stride + 1
    cols = []
    for i in range(kh):
        for j in range(kw):
            cols.append(xp[:, :, i:i + stride * oh:stride,
                               j:j + stride * ow:stride])
    patches = jnp.stack(cols, axis=2)              # (B, C, KH*KW, OH, OW)
    patches = patches.transpose(0, 3, 4, 1, 2)     # (B, OH, OW, C, KH*KW)
    return patches.reshape(B, oh * ow, C * kh * kw), oh, ow


def alexnet_forward(x, params):
    conv_w, conv_b = params["conv_w"], params["conv_b"]
    fc_w, fc_b = params["fc_w"], params["fc_b"]

    B = x.shape[0]
    OC, C, KH, KW = conv_w.shape
    num_classes = fc_w.shape[0]

    # ---- im2col (channel-major columns, like weight.reshape(OC, C*KH*KW)) ----
    patches, oh, ow = im2col_nchw(x, KH, KW, stride=4, pad=2)
    M, K = oh * ow, C * KH * KW
    Kp = _round_up(K, 128)
    OCp = _round_up(OC, 128)                       # lane-dense conv channels
    patches = jnp.pad(patches, ((0, 0), (0, 0), (0, Kp - K)))

    w_pad = jnp.pad(conv_w.reshape(OC, K).T, ((0, Kp - K), (0, OCp - OC)))
    b_pad = jnp.pad(conv_b, (0, OCp - OC)).reshape(1, OCp)

    # ---- maxpool geometry ----
    ksize, pstride = 3, 2
    ph = (oh - ksize) // pstride + 1
    pw = (ow - ksize) // pstride + 1
    assert (ph - 1) * pstride + ksize <= oh
    assert (pw - 1) * pstride + ksize <= ow

    # ---- fused Conv2d + ReLU + MaxPool2d, one grid step per batch element ----
    pooled = pl.pallas_call(
        make_conv_relu_pool_kernel(oh, ow, ph, pw, ksize, pstride),
        out_shape=jax.ShapeDtypeStruct((B, ph, pw, OCp), jnp.float32),
        grid=(B,),
        in_specs=[pl.BlockSpec((1, M, Kp), lambda b: (b, 0, 0)),
                  pl.BlockSpec((Kp, OCp), lambda b: (0, 0)),
                  pl.BlockSpec((1, OCp), lambda b: (0, 0))],
        out_specs=pl.BlockSpec((1, ph, pw, OCp), lambda b: (b, 0, 0, 0)),
        scratch_shapes=[pltpu.VMEM((M, OCp), jnp.float32)],
        compiler_params=pltpu.CompilerParams(
            dimension_semantics=("parallel",)),
    )(patches, w_pad, b_pad)

    # ---- flatten: pooled is NHWC(+padded C), so this is a free reshape ----
    F = ph * pw * OCp
    flat = pooled.reshape(B, F)

    # ---- classifier: fold the NCHW->NHWC(+pad) permutation into fc weights ----
    NCp = _round_up(num_classes, 128)              # lane-dense logits
    fc_w_nhwc = fc_w.reshape(num_classes, OC, ph, pw).transpose(0, 2, 3, 1)
    fc_w_nhwc = jnp.pad(
        fc_w_nhwc, ((0, NCp - num_classes), (0, 0), (0, 0), (0, OCp - OC)))
    fc_w_mat = fc_w_nhwc.reshape(NCp, F).T          # (F, NCp)
    fc_b_pad = jnp.pad(fc_b, (0, NCp - num_classes)).reshape(1, NCp)

    logits = pl.pallas_call(
        linear_kernel,
        out_shape=jax.ShapeDtypeStruct((B, NCp), jnp.float32),
        grid=(1,),
        in_specs=[pl.BlockSpec((B, F), lambda i: (0, 0)),
                  pl.BlockSpec((F, NCp), lambda i: (0, 0)),
                  pl.BlockSpec((1, NCp), lambda i: (0, 0))],
        out_specs=pl.BlockSpec((B, NCp), lambda i: (0, 0)),
    )(flat, fc_w_mat, fc_b_pad)
    return logits[:, :num_classes]


def alexnet_reference(x, params):
    """Pure-JAX reference for numerical validation."""
    conv_w, conv_b = params["conv_w"], params["conv_b"]
    fc_w, fc_b = params["fc_w"], params["fc_b"]
    y = lax.conv_general_dilated(
        x, conv_w, window_strides=(4, 4), padding=((2, 2), (2, 2)),
        dimension_numbers=("NCHW", "OIHW", "NCHW"))
    y = jnp.maximum(y + conv_b.reshape(1, -1, 1, 1), 0.0)
    y = lax.reduce_window(y, -jnp.inf, lax.max,
                          (1, 1, 3, 3), (1, 1, 2, 2), "VALID")
    flat = y.reshape(x.shape[0], -1)
    return flat @ fc_w.T + fc_b


if __name__ == "__main__":
    # Small configuration: AlexNet(num_classes=10, input_size=32), batch=2.
    B, C, H, W = 2, 3, 32, 32
    num_classes = 10
    OC, KH, KW = 64, 11, 11
    oh = 1 + (H + 2 * 2 - KH) // 4        # conv output spatial = 7
    ps = (oh - 3) // 2 + 1                # maxpool output spatial = 3
    fc_in = OC * ps * ps                  # 64 * 3 * 3 = 576

    key = jax.random.PRNGKey(0)
    ks = jax.random.split(key, 5)
    x = jax.random.normal(ks[0], (B, C, H, W), jnp.float32)
    params = {
        "conv_w": jax.random.normal(ks[1], (OC, C, KH, KW), jnp.float32) * 0.05,
        "conv_b": jax.random.normal(ks[2], (OC,), jnp.float32) * 0.05,
        "fc_w":   jax.random.normal(ks[3], (num_classes, fc_in), jnp.float32) * 0.05,
        "fc_b":   jax.random.normal(ks[4], (num_classes,), jnp.float32) * 0.05,
    }

    fwd = jax.jit(alexnet_forward)
    out = jax.block_until_ready(fwd(x, params))
    ref = alexnet_reference(x, params)

    assert out.shape == (B, num_classes), out.shape
    assert jnp.allclose(out, ref, rtol=1e-3, atol=1e-3), \
        float(jnp.max(jnp.abs(out - ref)))
    print("KERNEL_OK")
</pallas_src>

<mosaic_0001>
module attributes {stable_mosaic.version = 11 : i64} {
  func.func @kernel(%arg0: i32, %arg1: memref<1x49x384xf32, #tpu.memory_space<vmem>>, %arg2: memref<384x128xf32, #tpu.memory_space<vmem>>, %arg3: memref<1x128xf32, #tpu.memory_space<vmem>>, %arg4: memref<1x3x3x128xf32, #tpu.memory_space<vmem>>, %arg5: memref<49x128xf32, #tpu.memory_space<vmem>>) attributes {dimension_semantics = [#tpu.dimension_semantics<parallel>], iteration_bounds = array<i64: 2>, scalar_prefetch = 0 : i64, scratch_operands = 1 : i64, tpu.core_type = #tpu.core_type<tc>, window_params = [{transform_indices = @transform_0, window_bounds = array<i64: 1, 49, 384>}, {pipeline_mode = #tpu.pipeline_mode<synchronous>, transform_indices = @transform_1, window_bounds = array<i64: 384, 128>}, {pipeline_mode = #tpu.pipeline_mode<synchronous>, transform_indices = @transform_2, window_bounds = array<i64: 1, 128>}, {transform_indices = @transform_3, window_bounds = array<i64: 1, 3, 3, 128>}]} {
    %c0 = arith.constant 0 : index
    %c0_0 = arith.constant 0 : index
    %c0_1 = arith.constant 0 : index
    %0 = vector.load %arg1[%c0, %c0_0, %c0_1] : memref<1x49x384xf32, #tpu.memory_space<vmem>>, vector<1x49x384xf32>
    %1 = vector.shape_cast %0 : vector<1x49x384xf32> to vector<49x384xf32>
    %c0_2 = arith.constant 0 : index
    %c0_3 = arith.constant 0 : index
    %2 = vector.load %arg2[%c0_2, %c0_3] : memref<384x128xf32, #tpu.memory_space<vmem>>, vector<384x128xf32>
    %cst = arith.constant dense<0.000000e+00> : vector<49x128xf32>
    %3 = tpu.matmul %1, %2, %cst {dimension_numbers = #tpu.dot_dimension_numbers<[1], [0], [0], [1], [0, 0, 1, 1], [], []>} : vector<49x384xf32>, vector<384x128xf32>, vector<49x128xf32> -> vector<49x128xf32>
    %c0_4 = arith.constant 0 : index
    %c0_5 = arith.constant 0 : index
    %4 = vector.load %arg3[%c0_4, %c0_5] : memref<1x128xf32, #tpu.memory_space<vmem>>, vector<1x128xf32>
    %5 = vector.broadcast %4 : vector<1x128xf32> to vector<49x128xf32>
    %6 = arith.addf %3, %5 : vector<49x128xf32>
    %cst_6 = arith.constant 0.000000e+00 : f32
    %7 = vector.broadcast %cst_6 : f32 to vector<49x128xf32>
    %8 = arith.maximumf %6, %7 : vector<49x128xf32>
    %c0_7 = arith.constant 0 : index
    %c0_8 = arith.constant 0 : index
    %9 = vector.load %arg5[%c0_7, %c0_8] : memref<49x128xf32, #tpu.memory_space<vmem>>, vector<49x128xf32>
    tpu.vector_store %arg5[%c0_7, %c0_8], %8 {strides = array<i32>} : memref<49x128xf32, #tpu.memory_space<vmem>>, vector<49x128xf32>,
    %c0_9 = arith.constant 0 : index
    %c0_10 = arith.constant 0 : index
    %10 = tpu.strided_load %arg5[%c0_9, %c0_10] {strides = array<i32: 2, 1>} : memref<49x128xf32, #tpu.memory_space<vmem>>, vector<3x128xf32>
    %c1 = arith.constant 1 : index
    %c0_11 = arith.constant 0 : index
    %11 = tpu.strided_load %arg5[%c1, %c0_11] {strides = array<i32: 2, 1>} : memref<49x128xf32, #tpu.memory_space<vmem>>, vector<3x128xf32>
    %12 = arith.maximumf %10, %11 : vector<3x128xf32>
    %c2 = arith.constant 2 : index
    %c0_12 = arith.constant 0 : index
    %13 = tpu.strided_load %arg5[%c2, %c0_12] {strides = array<i32: 2, 1>} : memref<49x128xf32, #tpu.memory_space<vmem>>, vector<3x128xf32>
    %14 = arith.maximumf %12, %13 : vector<3x128xf32>
    %c7 = arith.constant 7 : index
    %c0_13 = arith.constant 0 : index
    %15 = tpu.strided_load %arg5[%c7, %c0_13] {strides = array<i32: 2, 1>} : memref<49x128xf32, #tpu.memory_space<vmem>>, vector<3x128xf32>
    %16 = arith.maximumf %14, %15 : vector<3x128xf32>
    %c8 = arith.constant 8 : index
    %c0_14 = arith.constant 0 : index
    %17 = tpu.strided_load %arg5[%c8, %c0_14] {strides = array<i32: 2, 1>} : memref<49x128xf32, #tpu.memory_space<vmem>>, vector<3x128xf32>
    %18 = arith.maximumf %16, %17 : vector<3x128xf32>
    %c9 = arith.constant 9 : index
    %c0_15 = arith.constant 0 : index
    %19 = tpu.strided_load %arg5[%c9, %c0_15] {strides = array<i32: 2, 1>} : memref<49x128xf32, #tpu.memory_space<vmem>>, vector<3x128xf32>
    %20 = arith.maximumf %18, %19 : vector<3x128xf32>
    %c14 = arith.constant 14 : index
    %c0_16 = arith.constant 0 : index
    %21 = tpu.strided_load %arg5[%c14, %c0_16] {strides = array<i32: 2, 1>} : memref<49x128xf32, #tpu.memory_space<vmem>>, vector<3x128xf32>
    %22 = arith.maximumf %20, %21 : vector<3x128xf32>
    %c15 = arith.constant 15 : index
    %c0_17 = arith.constant 0 : index
    %23 = tpu.strided_load %arg5[%c15, %c0_17] {strides = array<i32: 2, 1>} : memref<49x128xf32, #tpu.memory_space<vmem>>, vector<3x128xf32>
    %24 = arith.maximumf %22, %23 : vector<3x128xf32>
    %c16 = arith.constant 16 : index
    %c0_18 = arith.constant 0 : index
    %25 = tpu.strided_load %arg5[%c16, %c0_18] {strides = array<i32: 2, 1>} : memref<49x128xf32, #tpu.memory_space<vmem>>, vector<3x128xf32>
    %26 = arith.maximumf %24, %25 : vector<3x128xf32>
    %c0_19 = arith.constant 0 : index
    %c0_20 = arith.constant 0 : index
    %c0_21 = arith.constant 0 : index
    %c0_22 = arith.constant 0 : index
    %27 = vector.load %arg4[%c0_19, %c0_20, %c0_21, %c0_22] : memref<1x3x3x128xf32, #tpu.memory_space<vmem>>, vector<1x1x3x128xf32>
    %28 = vector.shape_cast %27 : vector<1x1x3x128xf32> to vector<3x128xf32>
    %29 = vector.shape_cast %26 : vector<3x128xf32> to vector<1x1x3x128xf32>
    tpu.vector_store %arg4[%c0_19, %c0_20, %c0_21, %c0_22], %29 {strides = array<i32>} : memref<1x3x3x128xf32, #tpu.memory_space<vmem>>, vector<1x1x3x128xf32>,
    %c14_23 = arith.constant 14 : index
    %c0_24 = arith.constant 0 : index
    %30 = tpu.strided_load %arg5[%c14_23, %c0_24] {strides = array<i32: 2, 1>} : memref<49x128xf32, #tpu.memory_space<vmem>>, vector<3x128xf32>
    %c15_25 = arith.constant 15 : index
    %c0_26 = arith.constant 0 : index
    %31 = tpu.strided_load %arg5[%c15_25, %c0_26] {strides = array<i32: 2, 1>} : memref<49x128xf32, #tpu.memory_space<vmem>>, vector<3x128xf32>
    %32 = arith.maximumf %30, %31 : vector<3x128xf32>
    %c16_27 = arith.constant 16 : index
    %c0_28 = arith.constant 0 : index
    %33 = tpu.strided_load %arg5[%c16_27, %c0_28] {strides = array<i32: 2, 1>} : memref<49x128xf32, #tpu.memory_space<vmem>>, vector<3x128xf32>
    %34 = arith.maximumf %32, %33 : vector<3x128xf32>
    %c21 = arith.constant 21 : index
    %c0_29 = arith.constant 0 : index
    %35 = tpu.strided_load %arg5[%c21, %c0_29] {strides = array<i32: 2, 1>} : memref<49x128xf32, #tpu.memory_space<vmem>>, vector<3x128xf32>
    %36 = arith.maximumf %34, %35 : vector<3x128xf32>
    %c22 = arith.constant 22 : index
    %c0_30 = arith.constant 0 : index
    %37 = tpu.strided_load %arg5[%c22, %c0_30] {strides = array<i32: 2, 1>} : memref<49x128xf32, #tpu.memory_space<vmem>>, vector<3x128xf32>
    %38 = arith.maximumf %36, %37 : vector<3x128xf32>
    %c23 = arith.constant 23 : index
    %c0_31 = arith.constant 0 : index
    %39 = tpu.strided_load %arg5[%c23, %c0_31] {strides = array<i32: 2, 1>} : memref<49x128xf32, #tpu.memory_space<vmem>>, vector<3x128xf32>
    %40 = arith.maximumf %38, %39 : vector<3x128xf32>
    %c28 = arith.constant 28 : index
    %c0_32 = arith.constant 0 : index
    %41 = tpu.strided_load %arg5[%c28, %c0_32] {strides = array<i32: 2, 1>} : memref<49x128xf32, #tpu.memory_space<vmem>>, vector<3x128xf32>
    %42 = arith.maximumf %40, %41 : vector<3x128xf32>
    %c29 = arith.constant 29 : index
    %c0_33 = arith.constant 0 : index
    %43 = tpu.strided_load %arg5[%c29, %c0_33] {strides = array<i32: 2, 1>} : memref<49x128xf32, #tpu.memory_space<vmem>>, vector<3x128xf32>
    %44 = arith.maximumf %42, %43 : vector<3x128xf32>
    %c30 = arith.constant 30 : index
    %c0_34 = arith.constant 0 : index
    %45 = tpu.strided_load %arg5[%c30, %c0_34] {strides = array<i32: 2, 1>} : memref<49x128xf32, #tpu.memory_space<vmem>>, vector<3x128xf32>
    %46 = arith.maximumf %44, %45 : vector<3x128xf32>
    %c0_35 = arith.constant 0 : index
    %c1_36 = arith.constant 1 : index
    %c0_37 = arith.constant 0 : index
    %c0_38 = arith.constant 0 : index
    %47 = vector.load %arg4[%c0_35, %c1_36, %c0_37, %c0_38] : memref<1x3x3x128xf32, #tpu.memory_space<vmem>>, vector<1x1x3x128xf32>
    %48 = vector.shape_cast %47 : vector<1x1x3x128xf32> to vector<3x128xf32>
    %49 = vector.shape_cast %46 : vector<3x128xf32> to vector<1x1x3x128xf32>
    tpu.vector_store %arg4[%c0_35, %c1_36, %c0_37, %c0_38], %49 {strides = array<i32>} : memref<1x3x3x128xf32, #tpu.memory_space<vmem>>, vector<1x1x3x128xf32>,
    %c28_39 = arith.constant 28 : index
    %c0_40 = arith.constant 0 : index
    %50 = tpu.strided_load %arg5[%c28_39, %c0_40] {strides = array<i32: 2, 1>} : memref<49x128xf32, #tpu.memory_space<vmem>>, vector<3x128xf32>
    %c29_41 = arith.constant 29 : index
    %c0_42 = arith.constant 0 : index
    %51 = tpu.strided_load %arg5[%c29_41, %c0_42] {strides = array<i32: 2, 1>} : memref<49x128xf32, #tpu.memory_space<vmem>>, vector<3x128xf32>
    %52 = arith.maximumf %50, %51 : vector<3x128xf32>
    %c30_43 = arith.constant 30 : index
    %c0_44 = arith.constant 0 : index
    %53 = tpu.strided_load %arg5[%c30_43, %c0_44] {strides = array<i32: 2, 1>} : memref<49x128xf32, #tpu.memory_space<vmem>>, vector<3x128xf32>
    %54 = arith.maximumf %52, %53 : vector<3x128xf32>
    %c35 = arith.constant 35 : index
    %c0_45 = arith.constant 0 : index
    %55 = tpu.strided_load %arg5[%c35, %c0_45] {strides = array<i32: 2, 1>} : memref<49x128xf32, #tpu.memory_space<vmem>>, vector<3x128xf32>
    %56 = arith.maximumf %54, %55 : vector<3x128xf32>
    %c36 = arith.constant 36 : index
    %c0_46 = arith.constant 0 : index
    %57 = tpu.strided_load %arg5[%c36, %c0_46] {strides = array<i32: 2, 1>} : memref<49x128xf32, #tpu.memory_space<vmem>>, vector<3x128xf32>
    %58 = arith.maximumf %56, %57 : vector<3x128xf32>
    %c37 = arith.constant 37 : index
    %c0_47 = arith.constant 0 : index
    %59 = tpu.strided_load %arg5[%c37, %c0_47] {strides = array<i32: 2, 1>} : memref<49x128xf32, #tpu.memory_space<vmem>>, vector<3x128xf32>
    %60 = arith.maximumf %58, %59 : vector<3x128xf32>
    %c42 = arith.constant 42 : index
    %c0_48 = arith.constant 0 : index
    %61 = tpu.strided_load %arg5[%c42, %c0_48] {strides = array<i32: 2, 1>} : memref<49x128xf32, #tpu.memory_space<vmem>>, vector<3x128xf32>
    %62 = arith.maximumf %60, %61 : vector<3x128xf32>
    %c43 = arith.constant 43 : index
    %c0_49 = arith.constant 0 : index
    %63 = tpu.strided_load %arg5[%c43, %c0_49] {strides = array<i32: 2, 1>} : memref<49x128xf32, #tpu.memory_space<vmem>>, vector<3x128xf32>
    %64 = arith.maximumf %62, %63 : vector<3x128xf32>
    %c44 = arith.constant 44 : index
    %c0_50 = arith.constant 0 : index
    %65 = tpu.strided_load %arg5[%c44, %c0_50] {strides = array<i32: 2, 1>} : memref<49x128xf32, #tpu.memory_space<vmem>>, vector<3x128xf32>
    %66 = arith.maximumf %64, %65 : vector<3x128xf32>
    %c0_51 = arith.constant 0 : index
    %c2_52 = arith.constant 2 : index
    %c0_53 = arith.constant 0 : index
    %c0_54 = arith.constant 0 : index
    %67 = vector.load %arg4[%c0_51, %c2_52, %c0_53, %c0_54] : memref<1x3x3x128xf32, #tpu.memory_space<vmem>>, vector<1x1x3x128xf32>
    %68 = vector.shape_cast %67 : vector<1x1x3x128xf32> to vector<3x128xf32>
    %69 = vector.shape_cast %66 : vector<3x128xf32> to vector<1x1x3x128xf32>
    tpu.vector_store %arg4[%c0_51, %c2_52, %c0_53, %c0_54], %69 {strides = array<i32>} : memref<1x3x3x128xf32, #tpu.memory_space<vmem>>, vector<1x1x3x128xf32>,
    return
  }
  func.func @transform_0(%arg0: i32) -> (i32, i32, i32) {
    %c0_i32 = arith.constant 0 : i32
    %c0_i32_0 = arith.constant 0 : i32
    %c0_i32_1 = arith.constant 0 : i32
    return %arg0, %c0_i32, %c0_i32_0 : i32, i32, i32
  }
  func.func @transform_1(%arg0: i32) -> (i32, i32) {
    %c0_i32 = arith.constant 0 : i32
    %c0_i32_0 = arith.constant 0 : i32
    %c0_i32_1 = arith.constant 0 : i32
    return %c0_i32, %c0_i32_0 : i32, i32
  }
  func.func @transform_2(%arg0: i32) -> (i32, i32) {
    %c0_i32 = arith.constant 0 : i32
    %c0_i32_0 = arith.constant 0 : i32
    %c0_i32_1 = arith.constant 0 : i32
    return %c0_i32, %c0_i32_0 : i32, i32
  }
  func.func @transform_3(%arg0: i32) -> (i32, i32, i32, i32) {
    %c0_i32 = arith.constant 0 : i32
    %c0_i32_0 = arith.constant 0 : i32
    %c0_i32_1 = arith.constant 0 : i32
    %c0_i32_2 = arith.constant 0 : i32
    return %arg0, %c0_i32, %c0_i32_0, %c0_i32_1 : i32, i32, i32, i32
  }
}

module attributes {stable_mosaic.version = 11 : i64} {
  func.func @linear_kernel(%arg0: i32, %arg1: memref<2x1152xf32, #tpu.memory_space<vmem>>, %arg2: memref<1152x128xf32, #tpu.memory_space<vmem>>, %arg3: memref<1x128xf32, #tpu.memory_space<vmem>>, %arg4: memref<2x128xf32, #tpu.memory_space<vmem>>) attributes {dimension_semantics = [#tpu.dimension_semantics<arbitrary>], iteration_bounds = array<i64: 1>, scalar_prefetch = 0 : i64, scratch_operands = 0 : i64, tpu.core_type = #tpu.core_type<tc>, window_params = [{pipeline_mode = #tpu.pipeline_mode<synchronous>, transform_indices = @transform_0, window_bounds = array<i64: 2, 1152>}, {pipeline_mode = #tpu.pipeline_mode<synchronous>, transform_indices = @transform_1, window_bounds = array<i64: 1152, 128>}, {pipeline_mode = #tpu.pipeline_mode<synchronous>, transform_indices = @transform_2, window_bounds = array<i64: 1, 128>}, {pipeline_mode = #tpu.pipeline_mode<synchronous>, transform_indices = @transform_3, window_bounds = array<i64: 2, 128>}]} {
    %c0 = arith.constant 0 : index
    %c0_0 = arith.constant 0 : index
    %0 = vector.load %arg1[%c0, %c0_0] : memref<2x1152xf32, #tpu.memory_space<vmem>>, vector<2x1152xf32>
    %c0_1 = arith.constant 0 : index
    %c0_2 = arith.constant 0 : index
    %1 = vector.load %arg2[%c0_1, %c0_2] : memref<1152x128xf32, #tpu.memory_space<vmem>>, vector<1152x128xf32>
    %cst = arith.constant dense<0.000000e+00> : vector<2x128xf32>
    %2 = tpu.matmul %0, %1, %cst {dimension_numbers = #tpu.dot_dimension_numbers<[1], [0], [0], [1], [0, 0, 1, 1], [], []>} : vector<2x1152xf32>, vector<1152x128xf32>, vector<2x128xf32> -> vector<2x128xf32>
    %c0_3 = arith.constant 0 : index
    %c0_4 = arith.constant 0 : index
    %3 = vector.load %arg3[%c0_3, %c0_4] : memref<1x128xf32, #tpu.memory_space<vmem>>, vector<1x128xf32>
    %4 = vector.broadcast %3 : vector<1x128xf32> to vector<2x128xf32>
    %5 = arith.addf %2, %4 : vector<2x128xf32>
    %c0_5 = arith.constant 0 : index
    %c0_6 = arith.constant 0 : index
    %6 = vector.load %arg4[%c0_5, %c0_6] : memref<2x128xf32, #tpu.memory_space<vmem>>, vector<2x128xf32>
    tpu.vector_store %arg4[%c0_5, %c0_6], %5 {strides = array<i32>} : memref<2x128xf32, #tpu.memory_space<vmem>>, vector<2x128xf32>,
    return
  }
  func.func @transform_0(%arg0: i32) -> (i32, i32) {
    %c0_i32 = arith.constant 0 : i32
    %c0_i32_0 = arith.constant 0 : i32
    %c0_i32_1 = arith.constant 0 : i32
    return %c0_i32, %c0_i32_0 : i32, i32
  }
  func.func @transform_1(%arg0: i32) -> (i32, i32) {
    %c0_i32 = arith.constant 0 : i32
    %c0_i32_0 = arith.constant 0 : i32
    %c0_i32_1 = arith.constant 0 : i32
    return %c0_i32, %c0_i32_0 : i32, i32
  }
  func.func @transform_2(%arg0: i32) -> (i32, i32) {
    %c0_i32 = arith.constant 0 : i32
    %c0_i32_0 = arith.constant 0 : i32
    %c0_i32_1 = arith.constant 0 : i32
    return %c0_i32, %c0_i32_0 : i32, i32
  }
  func.func @transform_3(%arg0: i32) -> (i32, i32) {
    %c0_i32 = arith.constant 0 : i32
    %c0_i32_0 = arith.constant 0 : i32
    %c0_i32_1 = arith.constant 0 : i32
    return %c0_i32, %c0_i32_0 : i32, i32
  }
}

</mosaic_0001>

<bundles_post_ra>
// kernel: alexnet_forward.2
= control target key start
LH: loop header
LB: loop body
LE: loop exit
PB: predicated region body
PF: predicated region fallthrough
CT: control target
= control target key end

     0   :  { %s833_s12 = smov 0   ;;  %s1070_s0 = inlined_call_operand.vmem [shape: f32[2,49,384], index: 0, kind: input, shape index: {}]   ;;  %s1071_s1 = inlined_call_operand.vmem [shape: f32[384,128], index: 1, kind: input, shape index: {}]   ;;  %s1072_s2 = inlined_call_operand.vmem [shape: f32[1,128], index: 2, kind: input, shape index: {}]   ;;  %s1073_s3 = inlined_call_operand.vmem [shape: f32[2,3,3,128], index: 3, kind: output, shape index: {}]  }
   0x1 LB: > { %s592_s13 = sadd.s32 4294967295, %s808_s12   ;;  %p596_p0 = scmp.ge.s32.totalorder %s808_s12, 1  ;;  %s808_s12 = sphi %s833_s12, %s13_s12  }
   0x2   : > { %p137_p1 = scmp.lt.s32.totalorder %s808_s12, 3 }
   0x4   : > { %p138_p2 = pnand %p596_p0, %p137_p1 }
   0x5   : > { %v208_v0 = vld [vmem:[%s1071_s1 + $0x80] sm:$0xff] (!%p138_p2)  ;;  %v209_v1 = vld [vmem:[%s1071_s1 + $0x88] sm:$0xff] (!%p138_p2)  ;;  %p852_p3 = scmp.lt.s32.totalorder (!%p138_p2), %s592_s13, 1  ;;  %v210_v5 = vld [vmem:[%s1071_s1 + $0x90] sm:$0xff] (!%p138_p2)  ;;  %v810_v7 = vmov (!%p138_p2), 0.0|0.0   ;;  %vm811_vm0 = vmmov (!%p138_p2), 0  }
   0x6   : > { %141 = sbr.rel (%p138_p2) target bundleno = 307 (0x133), region = 32  ;;  %v192_v2 = vld [vmem:[%s1071_s1] sm:$0xff] (!%p138_p2)  ;;  %v733_v3 = vpack.c.bf16 (!%p138_p2), %v209_v1, %v208_v0  ;;  %v193_v4 = vld [vmem:[%s1071_s1 + $0x8] sm:$0xff] (!%p138_p2)  ;;  %v211_v6 = vld [vmem:[%s1071_s1 + $0x98] sm:$0xff] (!%p138_p2)  ;;  %765 = vmatprep.subr.bf16.mxu1 (!%p138_p2), %v810_v7  ;;  %v812_v13 = vmov (!%p138_p2), 0.0  }
   0x7   : > { %v735_v8 = vpack.c.bf16 (!%p138_p2), %v193_v4, %v192_v2  ;;  %v737_v9 = vpack.c.bf16 (!%p138_p2), %v211_v6, %v210_v5  ;;  %v194_v10 = vld [vmem:[%s1071_s1 + $0x10] sm:$0xff] (!%p138_p2)  ;;  %v195_v11 = vld [vmem:[%s1071_s1 + $0x18] sm:$0xff] (!%p138_p2)  ;;  %v224_v12 = vld [vmem:[%s1071_s1 + $0x100] sm:$0xff] (!%p138_p2)  ;;  %712 = vmatprep.mubr.msk.f32.mxu1 (!%p138_p2), %vm811_vm0, %v812_v13 }
   0x8   : > { %734 = vmatprep.subr.bf16.mxu0 (!%p138_p2), %v733_v3  ;;  %v225_v14 = vld [vmem:[%s1071_s1 + $0x108] sm:$0xff] (!%p138_p2)  ;;  %v212_v15 = vld [vmem:[%s1071_s1 + $0xa0] sm:$0xff] (!%p138_p2)  ;;  %v739_v17 = vpack.c.bf16 (!%p138_p2), %v195_v11, %v194_v10  ;;  %v226_v19 = vld [vmem:[%s1071_s1 + $0x110] sm:$0xff] (!%p138_p2) }
   0x9   : > { %v213_v16 = vld [vmem:[%s1071_s1 + $0xa8] sm:$0xff] (!%p138_p2)  ;;  %736 = vmatpush3.bf16.msra.mxu0 (!%p138_p2), %v735_v8  ;;  %v766_v18 = vpack.c.bf16 (!%p138_p2), %v225_v14, %v224_v12  ;;  %v196_v21 = vld [vmem:[%s1071_s1 + $0x20] sm:$0xff] (!%p138_p2)  ;;  %v227_v23 = vld [vmem:[%s1071_s1 + $0x118] sm:$0xff] (!%p138_p2) }
   0xa   : > { %738 = vmatprep.subr.bf16.mxu0 (!%p138_p2), %v737_v9  ;;  %v741_v20 = vpack.c.bf16 (!%p138_p2), %v213_v16, %v212_v15  ;;  %v197_v22 = vld [vmem:[%s1071_s1 + $0x28] sm:$0xff] (!%p138_p2)  ;;  %v769_v24 = vpack.c.bf16 (!%p138_p2), %v227_v23, %v226_v19  ;;  %v214_v25 = vld [vmem:[%s1071_s1 + $0xb0] sm:$0xff] (!%p138_p2)  ;;  %v215_v26 = vld [vmem:[%s1071_s1 + $0xb8] sm:$0xff] (!%p138_p2) }
   0xb   : > { %767 = vmatpush3.bf16.msra.mxu1 (!%p138_p2), %v766_v18  ;;  %v228_v27 = vld [vmem:[%s1071_s1 + $0x120] sm:$0xff] (!%p138_p2)  ;;  %v229_v28 = vld [vmem:[%s1071_s1 + $0x128] sm:$0xff] (!%p138_p2)  ;;  %v743_v29 = vpack.c.bf16 (!%p138_p2), %v197_v22, %v196_v21  ;;  %v745_v30 = vpack.c.bf16 (!%p138_p2), %v215_v26, %v214_v25  ;;  %v198_v31 = vld [vmem:[%s1071_s1 + $0x30] sm:$0xff] (!%p138_p2) }
   0xc   : > { %768 = vmatprep.subr.bf16.mxu1 (!%p138_p2), %v810_v7  ;;  %v199_v32 = vld [vmem:[%s1071_s1 + $0x38] sm:$0xff] (!%p138_p2)  ;;  %v772_v33 = vpack.c.bf16 (!%p138_p2), %v229_v28, %v228_v27  ;;  %v216_v34 = vld [vmem:[%s1071_s1 + $0xc0] sm:$0xff] (!%p138_p2)  ;;  %v217_v35 = vld [vmem:[%s1071_s1 + $0xc8] sm:$0xff] (!%p138_p2) }
   0xd   : > { %s1076_s13 = smov (!%p852_p3, %s592_s13), 1  ;;  %740 = vmatpush3.bf16.msra.mxu0 %v739_v17  ;;  %v230_v36 = vld [vmem:[%s1071_s1 + $0x130] sm:$0xff]  ;;  %v231_v37 = vld [vmem:[%s1071_s1 + $0x138] sm:$0xff]  ;;  %v747_v38 = vpack.c.bf16 %v199_v32, %v198_v31  ;;  %v749_v39 = vpack.c.bf16 %v217_v35, %v216_v34  ;;  %v200_v40 = vld [vmem:[%s1071_s1 + $0x40] sm:$0xff] }
   0xe   : > { %s789_s30 = smul.u32 168, %s1076_s13  ;;  %742 = vmatprep.subr.bf16.mxu0 %v741_v20  ;;  %v201_v41 = vld [vmem:[%s1071_s1 + $0x48] sm:$0xff]  ;;  %v775_v42 = vpack.c.bf16 %v231_v37, %v230_v36  ;;  %v218_v43 = vld [vmem:[%s1071_s1 + $0xd0] sm:$0xff]  ;;  %v219_v44 = vld [vmem:[%s1071_s1 + $0xd8] sm:$0xff] }
   0xf   : > { %770 = vmatpush3.bf16.msra.mxu1 %v769_v24  ;;  %v232_v45 = vld [vmem:[%s1071_s1 + $0x140] sm:$0xff]  ;;  %v233_v46 = vld [vmem:[%s1071_s1 + $0x148] sm:$0xff]  ;;  %v751_v48 = vpack.c.bf16 %v201_v41, %v200_v40  ;;  %v753_v49 = vpack.c.bf16 %v219_v44, %v218_v43  ;;  %v202_v50 = vld [vmem:[%s1071_s1 + $0x50] sm:$0xff] }
  0x10   : > { %771 = vmatprep.subr.bf16.mxu1 %v810_v7  ;;  %s940_s21 = scalar_lea.vmem %s1070_s0, %s789_s30  ;;  %v203_v51 = vld [vmem:[%s1071_s1 + $0x58] sm:$0xff]  ;;  %v778_v52 = vpack.c.bf16 %v233_v46, %v232_v45  ;;  %v220_v53 = vld [vmem:[%s1071_s1 + $0xe0] sm:$0xff]  ;;  %v221_v54 = vld [vmem:[%s1071_s1 + $0xe8] sm:$0xff] }
  0x11   : > { %744 = vmatpush3.bf16.msra.mxu0 %v743_v29  ;;  %v172_v47 = vld [vmem:[%s940_s21 + $0x8] sm:$0xff]  ;;  %v234_v55 = vld [vmem:[%s1071_s1 + $0x150] sm:$0xff]  ;;  %v235_v56 = vld [vmem:[%s1071_s1 + $0x158] sm:$0xff]  ;;  %v755_v57 = vpack.c.bf16 %v203_v51, %v202_v50  ;;  %v757_v58 = vpack.c.bf16 %v221_v54, %v220_v53 }
  0x12   : > { %746 = vmatprep.subr.bf16.mxu0 %v745_v30  ;;  %311 = vmatprep.mubr.f32.mxu0 %v172_v47  ;;  %v204_v59 = vld [vmem:[%s1071_s1 + $0x60] sm:$0xff]  ;;  %v205_v60 = vld [vmem:[%s1071_s1 + $0x68] sm:$0xff]  ;;  %v781_v61 = vpack.c.bf16 %v235_v56, %v234_v55  ;;  %v222_v62 = vld [vmem:[%s1071_s1 + $0xf0] sm:$0xff] }
  0x13   : > { %773 = vmatpush3.bf16.msra.mxu1 %v772_v33  ;;  %v223_v63 = vld [vmem:[%s1071_s1 + $0xf8] sm:$0xff]  ;;  %v236_v0 = vld [vmem:[%s1071_s1 + $0x160] sm:$0xff]  ;;  %v237_v1 = vld [vmem:[%s1071_s1 + $0x168] sm:$0xff]  ;;  %v759_v2 = vpack.c.bf16 %v205_v60, %v204_v59 }
  0x14   : > { %774 = vmatprep.subr.bf16.mxu1 %v810_v7  ;;  %v761_v3 = vpack.c.bf16 %v223_v63, %v222_v62  ;;  %v206_v4 = vld [vmem:[%s1071_s1 + $0x70] sm:$0xff]  ;;  %v207_v5 = vld [vmem:[%s1071_s1 + $0x78] sm:$0xff]  ;;  %v784_v6 = vpack.c.bf16 %v237_v1, %v236_v0  ;;  %v171_v12 = vld [vmem:[%s940_s21] sm:$0xff] }
  0x15   : > { %748 = vmatpush3.bf16.msra.mxu0 %v747_v38  ;;  %v238_v8 = vld [vmem:[%s1071_s1 + $0x170] sm:$0xff]  ;;  %v239_v9 = vld [vmem:[%s1071_s1 + $0x178] sm:$0xff]  ;;  %v763_v10 = vpack.c.bf16 %v207_v5, %v206_v4  ;;  %v175_v14 = vld [vmem:[%s940_s21 + $0x20] sm:$0xff] }
  0x16   : > { %750 = vmatprep.subr.bf16.mxu0 %v749_v39  ;;  %v787_v11 = vpack.c.bf16 %v239_v9, %v238_v8  ;;  %v173_v15 = vld [vmem:[%s940_s21 + $0x10] sm:$0xff]  ;;  %v174_v16 = vld [vmem:[%s940_s21 + $0x18] sm:$0xff]  ;;  %v176_v18 = vld [vmem:[%s940_s21 + $0x28] sm:$0xff] }
  0x17   : > { %776 = vmatpush3.bf16.msra.mxu1 %v775_v42  ;;  %v178_v17 = vld [vmem:[%s940_s21 + $0x38] sm:$0xff]  ;;  %v181_v19 = vld [vmem:[%s940_s21 + $0x50] sm:$0xff]  ;;  %v179_v20 = vld [vmem:[%s940_s21 + $0x40] sm:$0xff] }
  0x18   : > { %777 = vmatprep.subr.bf16.mxu1 %v810_v7  ;;  %v180_v21 = vld [vmem:[%s940_s21 + $0x48] sm:$0xff]  ;;  %v182_v23 = vld [vmem:[%s940_s21 + $0x58] sm:$0xff]  ;;  %v183_v24 = vld [vmem:[%s940_s21 + $0x60] sm:$0xff] }
  0x19   : > { %752 = vmatpush3.bf16.msra.mxu0 %v751_v48  ;;  %v184_v22 = vld [vmem:[%s940_s21 + $0x68] sm:$0xff]  ;;  %v187_v25 = vld [vmem:[%s940_s21 + $0x80] sm:$0xff]  ;;  %v185_v26 = vld [vmem:[%s940_s21 + $0x70] sm:$0xff] }
  0x1a   : > { %754 = vmatprep.subr.bf16.mxu0 %v753_v49  ;;  %v186_v27 = vld [vmem:[%s940_s21 + $0x78] sm:$0xff]  ;;  %v188_v29 = vld [vmem:[%s940_s21 + $0x88] sm:$0xff]  ;;  %v189_v30 = vld [vmem:[%s940_s21 + $0x90] sm:$0x1] }
  0x1b   : > { %779 = vmatpush3.bf16.msra.mxu1 %v778_v52  ;;  %v190_v28 = vld [vmem:[%s940_s21 + $0x98] sm:$0x1]  ;;  %v191_v31 = vld [vmem:[%s940_s21 + $0xa0] sm:$0x1] }
  0x1c   : > { %780 = vmatprep.subr.bf16.mxu1 %v810_v7  ;;  %v1049_v34 = vld [vmem:[%s1072_s2] ss:$0 sm:$0xff] }
  0x1d   : > { %756 = vmatpush3.bf16.msra.mxu0 %v755_v57 }
  0x1e   : > { %758 = vmatprep.subr.bf16.mxu0 %v757_v58 }
  0x1f   : > { %782 = vmatpush3.bf16.msra.mxu1 %v781_v61 }
  0x20   : > { %783 = vmatprep.subr.bf16.mxu1 %v810_v7 }
  0x21   : > { %760 = vmatpush3.bf16.msra.mxu0 %v759_v2 }
  0x22   : > { %762 = vmatprep.subr.bf16.mxu0 %v761_v3 }
  0x23   : > { %785 = vmatpush3.bf16.msra.mxu1 %v784_v6 }
  0x24   : > { %786 = vmatprep.subr.bf16.mxu1 %v810_v7  ;;  %v177_v7 = vld [vmem:[%s940_s21 + $0x30] sm:$0xff]  ;;  %s790_s21 = smul.u32 12, %s1076_s13 }
  0x25   : > { %764 = vmatpush3.bf16.msra.mxu0 %v763_v10 }
  0x26   : > { %s1061_s19 = scalar_lea.vmem %s1073_s3, %s790_s21 }
  0x27   : > { %788 = vmatpush3.bf16.msra.mxu1 %v787_v11 }
  0x28   : > { %312 = vmatmul.mubr.f32.vlgmr.msra.gmra.mrb[0].mxu0 %v171_v12 }
  0x29   : > { %316 = vmatprep.mubr.f32.mxu0 %v175_v14 }
  0x2a   : > { %713 = vmatmul.mubr.f32.vlgmr.msra.gmra.mrb[0].mxu1 %v173_v15 }
  0x2b   : > { %715 = vmatprep.mubr.msk.f32.mxu1 %vm811_vm0, %v812_v13 }
  0x2c   : > { %317 = vmatmul.mubr.f32.gmra.mrb[2].mxu0 %v174_v16 }
  0x2d   : > { %321 = vmatprep.mubr.f32.mxu0 %v178_v17 }
  0x2e   : > { %716 = vmatmul.mubr.f32.gmra.mrb[2].mxu1 %v176_v18 }
  0x2f   : > { %718 = vmatprep.mubr.msk.f32.mxu1 %vm811_vm0, %v812_v13 }
  0x30   : > { %322 = vmatmul.mubr.f32.gmra.mrb[4].mxu0 %v177_v7 }
  0x31   : > { %326 = vmatprep.mubr.f32.mxu0 %v181_v19 }
  0x32   : > { %719 = vmatmul.mubr.f32.gmra.mrb[4].mxu1 %v179_v20 }
  0x33   : > { %721 = vmatprep.mubr.msk.f32.mxu1 %vm811_vm0, %v812_v13 }
  0x34   : > { %327 = vmatmul.mubr.f32.gmra.mrb[6].mxu0 %v180_v21 }
  0x35   : > { %331 = vmatprep.mubr.f32.mxu0 %v184_v22 }
  0x36   : > { %722 = vmatmul.mubr.f32.gmra.mrb[6].mxu1 %v182_v23 }
  0x37   : > { %724 = vmatprep.mubr.msk.f32.mxu1 %vm811_vm0, %v812_v13 }
  0x38   : > { %332 = vmatmul.mubr.f32.gmra.mrb[8].mxu0 %v183_v24 }
  0x39   : > { %336 = vmatprep.mubr.f32.mxu0 %v187_v25 }
  0x3a   : > { %725 = vmatmul.mubr.f32.gmra.mrb[8].mxu1 %v185_v26 }
  0x3b   : > { %727 = vmatprep.mubr.msk.f32.mxu1 %vm811_vm0, %v812_v13 }
  0x3c   : > { %337 = vmatmul.mubr.f32.gmra.mrb[10].mxu0 %v186_v27 }
  0x3d   : > { %341 = vmatprep.mubr.f32.mxu0 %v190_v28 }
  0x3e   : > { %728 = vmatmul.mubr.f32.gmra.mrb[10].mxu1 %v188_v29 }
  0x3f   : > { %730 = vmatprep.mubr.msk.f32.mxu1 %vm811_vm0, %v812_v13 }
  0x40   : > { %342 = vmatmul.mubr.f32.gmra.mrb[12].mxu0 %v189_v30 }
  0x42   : > { %731 = vmatmul.mubr.f32.gmra.mrb[12].mxu1 %v191_v31 }
  0xfb   : > { %v636_v32 = vpop.f32.mrb[0].mxu0 }
  0xfc   : > { %v637_v33 = vpop.f32.mrb[1].mxu0 }
  0xfd   : > { %v638_v35 = vadd.f32 %v637_v33, %v636_v32  ;;  %v413_v36 = vpop.f32.mrb[0].mxu1 }
  0xfe   : > { %v714_v37 = vpop.f32.mrb[1].mxu1 }
  0xff   : > { %v639_v38 = vpop.f32.mrb[2].mxu0  ;;  %v314_v39 = vadd.f32 %v638_v35, %v1049_v34 }
 0x100   : > { %v640_v40 = vpop.f32.mrb[3].mxu0 }
 0x101   : > { %v414_v41 = vadd.f32 %v413_v36, %v314_v39  ;;  %v641_v42 = vadd.f32 %v640_v40, %v639_v38  ;;  %v418_v13 = vpop.f32.mrb[2].mxu1 }
 0x102   : > { %v717_v43 = vpop.f32.mrb[3].mxu1 }
 0x103   : > { %v447_v44 = vmax.f32 %v414_v41, 0.0  ;;  %v642_v45 = vpop.f32.mrb[4].mxu0  ;;  %v319_v46 = vadd.f32 %v641_v42, %v1049_v34 }
 0x104   : > { %v643_v47 = vpop.f32.mrb[5].mxu0 }
 0x105   : > { %454 = vst [vmem:[#allocation2] sm:$0xff] %v447_v44  ;;  %v419_v48 = vadd.f32 %v418_v13, %v319_v46  ;;  %v644_v49 = vadd.f32 %v643_v47, %v642_v45  ;;  %v423_v50 = vpop.f32.mrb[4].mxu1 }
 0x106   : > { %v720_v51 = vpop.f32.mrb[5].mxu1 }
 0x107   : > { %v448_v52 = vmax.f32 %v419_v48, 0.0  ;;  %v645_v53 = vpop.f32.mrb[6].mxu0  ;;  %v324_v54 = vadd.f32 %v644_v49, %v1049_v34 }
 0x108   : > { %v646_v55 = vpop.f32.mrb[7].mxu0 }
 0x109   : > { %455 = vst [vmem:[#allocation2 + $0x8] sm:$0xff] %v448_v52  ;;  %v424_v56 = vadd.f32 %v423_v50, %v324_v54  ;;  %v647_v57 = vadd.f32 %v646_v55, %v645_v53  ;;  %v428_v58 = vpop.f32.mrb[6].mxu1 }
 0x10a   : > { %v723_v59 = vpop.f32.mrb[7].mxu1 }
 0x10b   : > { %v449_v60 = vmax.f32 %v424_v56, 0.0  ;;  %v648_v61 = vpop.f32.mrb[8].mxu0  ;;  %v329_v62 = vadd.f32 %v647_v57, %v1049_v34 }
 0x10c   : > { %v461_v63 = vld [vmem:[#allocation2] ss:$2 sm:$0x7]  ;;  %v463_v0 = vld [vmem:[#allocation2 + $0x1] ss:$2 sm:$0x7] }
 0x10d   : > { %v464_v1 = vmax.f32 %v461_v63, %v463_v0  ;;  %456 = vst [vmem:[#allocation2 + $0x10] sm:$0xff] %v449_v60  ;;  %v429_v2 = vadd.f32 %v428_v58, %v329_v62  ;;  %v649_v3 = vpop.f32.mrb[9].mxu0  ;;  %v433_v4 = vpop.f32.mrb[8].mxu1  ;;  %v466_v5 = vld [vmem:[#allocation2 + $0x2] ss:$2 sm:$0x7] }
 0x10e   : > { %v650_v6 = vadd.f32 %v649_v3, %v648_v61  ;;  %v726_v8 = vpop.f32.mrb[9].mxu1 }
 0x10f   : > { %v467_v9 = vmax.f32 %v464_v1, %v466_v5  ;;  %v450_v10 = vmax.f32 %v429_v2, 0.0  ;;  %v651_v11 = vpop.f32.mrb[10].mxu0 }
 0x110   : > { %v469_v12 = vld [vmem:[#allocation2 + $0x7] ss:$2 sm:$0x7]  ;;  %v334_v14 = vadd.f32 %v650_v6, %v1049_v34  ;;  %v652_v16 = vpop.f32.mrb[11].mxu0 }
 0x111   : > { %v470_v15 = vmax.f32 %v467_v9, %v469_v12  ;;  %457 = vst [vmem:[#allocation2 + $0x18] sm:$0xff] %v450_v10  ;;  %v438_v17 = vpop.f32.mrb[10].mxu1  ;;  %v472_v18 = vld [vmem:[#allocation2 + $0x8] ss:$2 sm:$0x7]  ;;  %v653_v19 = vadd.f32 %v652_v16, %v651_v11 }
 0x112   : > { %v434_v7 = vadd.f32 %v433_v4, %v334_v14  ;;  %v729_v20 = vpop.f32.mrb[11].mxu1  ;;  %v475_v23 = vld [vmem:[#allocation2 + $0x9] ss:$2 sm:$0x7] }
 0x113   : > { %v473_v21 = vmax.f32 %v470_v15, %v472_v18  ;;  %v654_v22 = vpop.f32.mrb[12].mxu0  ;;  %v339_v24 = vadd.f32 %v653_v19, %v1049_v34 }
 0x114   : > { %v487_v26 = vld [vmem:[#allocation2 + $0xe] ss:$2 sm:$0x7]  ;;  %v488_v28 = vld [vmem:[#allocation2 + $0xf] ss:$2 sm:$0x7] }
 0x115   : > { %v476_v25 = vmax.f32 %v473_v21, %v475_v23  ;;  %v478_v27 = vld [vmem:[#allocation2 + $0xe] ss:$2 sm:$0x7]  ;;  %v439_v29 = vadd.f32 %v438_v17, %v339_v24  ;;  %v481_v31 = vld [vmem:[#allocation2 + $0xf] ss:$2 sm:$0x7]  ;;  %v489_v32 = vmax.f32 %v487_v26, %v488_v28 }
 0x116   : > { %v451_v33 = vmax.f32 %v434_v7, 0.0  ;;  %v655_v35 = vpop.f32.mrb[13].mxu0  ;;  %v443_v36 = vpop.f32.mrb[12].mxu1  ;;  %v490_v37 = vld [vmem:[#allocation2 + $0x10] ss:$2 sm:$0x7] }
 0x117   : > { %v479_v30 = vmax.f32 %v476_v25, %v478_v27  ;;  %v656_v39 = vadd.f32 %v655_v35, %v654_v22  ;;  %v491_v41 = vmax.f32 %v489_v32, %v490_v37  ;;  %v452_v42 = vmax.f32 %v439_v29, 0.0  ;;  %v732_v13 = vpop.f32.mrb[13].mxu1  ;;  %v484_v43 = vld [vmem:[#allocation2 + $0x10] ss:$2 sm:$0x7] }
 0x118   : > { %v493_v38 = vld [vmem:[#allocation2 + $0x15] ss:$2 sm:$0x7]  ;;  %458 = vst [vmem:[#allocation2 + $0x20] sm:$0xff] %v451_v33 }
 0x119   : > { %v482_v40 = vmax.f32 %v479_v30, %v481_v31  ;;  %v344_v44 = vadd.f32 %v656_v39, %v1049_v34  ;;  %v494_v46 = vmax.f32 %v491_v41, %v493_v38  ;;  %459 = vst [vmem:[#allocation2 + $0x28] sm:$0xff] %v452_v42  ;;  %v496_v47 = vld [vmem:[#allocation2 + $0x16] ss:$2 sm:$0x7] }
 0x11a   : > { %v499_v50 = vld [vmem:[#allocation2 + $0x17] ss:$2 sm:$0x7] }
 0x11b   : > { %v485_v45 = vmax.f32 %v482_v40, %v484_v43  ;;  %v444_v48 = vadd.f32 %v443_v36, %v344_v44  ;;  %v497_v49 = vmax.f32 %v494_v46, %v496_v47 }
 0x11d   : > { %486 = vst [vmem:[%s1061_s19] sm:$0x7] %v485_v45  ;;  %v453_v51 = vmax.f32 %v444_v48, 0.0  ;;  %v500_v52 = vmax.f32 %v497_v49, %v499_v50 }
 0x11f   : > { %v502_v53 = vld [vmem:[#allocation2 + $0x1c] ss:$2 sm:$0x7]  ;;  %460 = vst [vmem:[#allocation2 + $0x30] sm:$0x1] %v453_v51 }
 0x120   : > { %v503_v54 = vmax.f32 %v500_v52, %v502_v53  ;;  %v512_v55 = vld [vmem:[#allocation2 + $0x1c] ss:$2 sm:$0x7]  ;;  %v505_v56 = vld [vmem:[#allocation2 + $0x1d] ss:$2 sm:$0x7] }
 0x121   : > { %v513_v57 = vld [vmem:[#allocation2 + $0x1d] ss:$2 sm:$0x7]  ;;  %v508_v34 = vld [vmem:[#allocation2 + $0x1e] ss:$2 sm:$0x7] }
 0x122   : > { %v506_v58 = vmax.f32 %v503_v54, %v505_v56  ;;  %v514_v59 = vmax.f32 %v512_v55, %v513_v57  ;;  %v515_v60 = vld [vmem:[#allocation2 + $0x1e] ss:$2 sm:$0x7]  ;;  %v518_v63 = vld [vmem:[#allocation2 + $0x23] ss:$2 sm:$0x7] }
 0x123   : > { %v521_v1 = vld [vmem:[#allocation2 + $0x24] ss:$2 sm:$0x7]  ;;  %v524_v3 = vld [vmem:[#allocation2 + $0x25] ss:$2 sm:$0x7] }
 0x124   : > { %v509_v61 = vmax.f32 %v506_v58, %v508_v34  ;;  %v516_v62 = vmax.f32 %v514_v59, %v515_v60  ;;  %v527_v5 = vld [vmem:[#allocation2 + $0x2a] ss:$2 sm:$0x7]  ;;  %v530_v8 = vld [vmem:[#allocation2 + $0x2b] ss:$2 sm:$0x7] }
 0x126   : > { %600 = vst [vmem:[%s1061_s19 + $0x4] sm:$0x7] %v509_v61  ;;  %v519_v0 = vmax.f32 %v516_v62, %v518_v63  ;;  %v533_v10 = vld [vmem:[#allocation2 + $0x2c] ss:$2 sm:$0x7] }
 0x128   : > { %v522_v2 = vmax.f32 %v519_v0, %v521_v1 }
 0x12a   : > { %v525_v4 = vmax.f32 %v522_v2, %v524_v3 }
 0x12c   : > { %v528_v6 = vmax.f32 %v525_v4, %v527_v5 }
 0x12e   : > { %v531_v9 = vmax.f32 %v528_v6, %v530_v8 }
 0x130   : > { %v534_v11 = vmax.f32 %v531_v9, %v533_v10 }
 0x132   : > { %601 = vst [vmem:[%s1061_s19 + $0x8] sm:$0x7] %v534_v11 }
 0x133 PF: > { %s13_s12 = sadd.s32 1, %s808_s12  }
 0x134   : > { %p10_p4 = scmp.ge.s32.totalorder %s13_s12, 4  }
 0x136   :  { %12 = sbr.rel (!%p10_p4) target bundleno = 1 (0x1), region = 84 }

// kernel: alexnet_forward.3
= control target key start
LH: loop header
LB: loop body
LE: loop exit
PB: predicated region body
PF: predicated region fallthrough
CT: control target
= control target key end

     0   :  { %v964_v43 = vmov 1983009808   ;;  %v176_v45 = vlaneseq  ;;  %s1461_s0 = inlined_call_operand.vmem [shape: f32[2,1152], index: 0, kind: input, shape index: {}]   ;;  %s1462_s1 = inlined_call_operand.vmem [shape: f32[1152,128], index: 1, kind: input, shape index: {}]   ;;  %s1463_s2 = inlined_call_operand.vmem [shape: f32[1,128], index: 2, kind: input, shape index: {}]   ;;  %s1464_s3 = inlined_call_operand.hbm [shape: f32[2,128], index: 3, kind: output, shape index: {}]  }
   0x1   :  { %v34_v0 = vld [vmem:[%s1462_s1 + $0x80] sm:$0xff]  ;;  %v35_v1 = vld [vmem:[%s1462_s1 + $0x88] sm:$0xff]  ;;  %v36_v11 = vld [vmem:[%s1462_s1 + $0x90] sm:$0xff]  ;;  %v174_v44 = vunpack.c.l.s4 %v964_v43 }
   0x2   :  { %v18_v2 = vld [vmem:[%s1462_s1] sm:$0xff]  ;;  %v781_v3 = vpack.c.bf16 %v35_v1, %v34_v0  ;;  %v19_v4 = vld [vmem:[%s1462_s1 + $0x8] sm:$0xff]  ;;  %v37_v13 = vld [vmem:[%s1462_s1 + $0x98] sm:$0xff]  ;;  %v177_v60 = vshrl.u32 %v176_v45, 7 }
   0x3   :  { %v66_v5 = vld [vmem:[%s1462_s1 + $0x180] sm:$0xff]  ;;  %v67_v6 = vld [vmem:[%s1462_s1 + $0x188] sm:$0xff]  ;;  %v783_v7 = vpack.c.bf16 %v19_v4, %v18_v2  ;;  %v20_v14 = vld [vmem:[%s1462_s1 + $0x10] sm:$0xff]  ;;  %v785_v16 = vpack.c.bf16 %v37_v13, %v36_v11  ;;  %v175_v59 = vunpack.c.0.s8 %v174_v44 }
   0x4   :  { %v813_v8 = vpack.c.bf16 %v67_v6, %v66_v5  ;;  %v50_v9 = vld [vmem:[%s1462_s1 + $0x100] sm:$0xff]  ;;  %v51_v10 = vld [vmem:[%s1462_s1 + $0x108] sm:$0xff]  ;;  %782 = vmatprep.subr.bf16.mxu0 %v781_v3  ;;  %v21_v15 = vld [vmem:[%s1462_s1 + $0x18] sm:$0xff] }
   0x5   :  { %v815_v12 = vpack.c.bf16 %v51_v10, %v50_v9  ;;  %784 = vmatpush3.bf16.msra.mxu0 %v783_v7  ;;  %v787_v17 = vpack.c.bf16 %v21_v15, %v20_v14  ;;  %v68_v18 = vld [vmem:[%s1462_s1 + $0x190] sm:$0xff]  ;;  %v69_v19 = vld [vmem:[%s1462_s1 + $0x198] sm:$0xff]  ;;  %v38_v23 = vld [vmem:[%s1462_s1 + $0xa0] sm:$0xff]  ;;  %v1133_v10 = vsub.s32 %v175_v59, %v177_v60 }
   0x6   :  { %814 = vmatprep.subr.bf16.mxu1 %v813_v8  ;;  %v52_v20 = vld [vmem:[%s1462_s1 + $0x110] sm:$0xff]  ;;  %v817_v21 = vpack.c.bf16 %v69_v19, %v68_v18  ;;  %v53_v22 = vld [vmem:[%s1462_s1 + $0x118] sm:$0xff]  ;;  %v39_v24 = vld [vmem:[%s1462_s1 + $0xa8] sm:$0xff]  ;;  %786 = vmatprep.subr.bf16.mxu0 %v785_v16 }
   0x7   :  { %816 = vmatpush3.bf16.msra.mxu1 %v815_v12  ;;  %v819_v25 = vpack.c.bf16 %v53_v22, %v52_v20  ;;  %v789_v26 = vpack.c.bf16 %v39_v24, %v38_v23  ;;  %v22_v27 = vld [vmem:[%s1462_s1 + $0x20] sm:$0xff]  ;;  %v23_v28 = vld [vmem:[%s1462_s1 + $0x28] sm:$0xff]  ;;  %v40_v35 = vld [vmem:[%s1462_s1 + $0xb0] sm:$0xff] }
   0x8   :  { %v70_v29 = vld [vmem:[%s1462_s1 + $0x1a0] sm:$0xff]  ;;  %818 = vmatprep.subr.bf16.mxu1 %v817_v21  ;;  %v71_v30 = vld [vmem:[%s1462_s1 + $0x1a8] sm:$0xff]  ;;  %v791_v33 = vpack.c.bf16 %v23_v28, %v22_v27  ;;  %v41_v36 = vld [vmem:[%s1462_s1 + $0xb8] sm:$0xff] }
   0x9   :  { %v54_v31 = vld [vmem:[%s1462_s1 + $0x120] sm:$0xff]  ;;  %v55_v32 = vld [vmem:[%s1462_s1 + $0x128] sm:$0xff]  ;;  %788 = vmatpush3.bf16.msra.mxu0 %v787_v17  ;;  %v821_v34 = vpack.c.bf16 %v71_v30, %v70_v29  ;;  %v24_v37 = vld [vmem:[%s1462_s1 + $0x30] sm:$0xff]  ;;  %v793_v39 = vpack.c.bf16 %v41_v36, %v40_v35 }
   0xa   :  { %790 = vmatprep.subr.bf16.mxu0 %v789_v26  ;;  %v823_v38 = vpack.c.bf16 %v55_v32, %v54_v31  ;;  %v25_v40 = vld [vmem:[%s1462_s1 + $0x38] sm:$0xff]  ;;  %v72_v41 = vld [vmem:[%s1462_s1 + $0x1b0] sm:$0xff]  ;;  %v42_v49 = vld [vmem:[%s1462_s1 + $0xc0] sm:$0xff] }
   0xb   :  { %820 = vmatpush3.bf16.msra.mxu1 %v819_v25  ;;  %v73_v42 = vld [vmem:[%s1462_s1 + $0x1b8] sm:$0xff]  ;;  %v56_v47 = vld [vmem:[%s1462_s1 + $0x130] sm:$0xff]  ;;  %v43_v50 = vld [vmem:[%s1462_s1 + $0xc8] sm:$0xff]  ;;  %v795_v51 = vpack.c.bf16 %v25_v40, %v24_v37 }
   0xc   :  { %822 = vmatprep.subr.bf16.mxu1 %v821_v34  ;;  %v825_v46 = vpack.c.bf16 %v73_v42, %v72_v41  ;;  %v57_v48 = vld [vmem:[%s1462_s1 + $0x138] sm:$0xff]  ;;  %v74_v52 = vld [vmem:[%s1462_s1 + $0x1c0] sm:$0xff]  ;;  %v75_v53 = vld [vmem:[%s1462_s1 + $0x1c8] sm:$0xff]  ;;  %v797_v55 = vpack.c.bf16 %v43_v50, %v42_v49 }
   0xd   :  { %792 = vmatpush3.bf16.msra.mxu0 %v791_v33  ;;  %v827_v54 = vpack.c.bf16 %v57_v48, %v56_v47  ;;  %v26_v56 = vld [vmem:[%s1462_s1 + $0x40] sm:$0xff]  ;;  %v27_v57 = vld [vmem:[%s1462_s1 + $0x48] sm:$0xff]  ;;  %v829_v61 = vpack.c.bf16 %v75_v53, %v74_v52  ;;  %v44_v63 = vld [vmem:[%s1462_s1 + $0xd0] sm:$0xff] }
   0xe   :  { %794 = vmatprep.subr.bf16.mxu0 %v793_v39  ;;  %v58_v58 = vld [vmem:[%s1462_s1 + $0x140] sm:$0xff]  ;;  %v59_v62 = vld [vmem:[%s1462_s1 + $0x148] sm:$0xff]  ;;  %v45_v0 = vld [vmem:[%s1462_s1 + $0xd8] sm:$0xff]  ;;  %v799_v3 = vpack.c.bf16 %v27_v57, %v26_v56 }
   0xf   :  { %824 = vmatpush3.bf16.msra.mxu1 %v823_v38  ;;  %v76_v1 = vld [vmem:[%s1462_s1 + $0x1d0] sm:$0xff]  ;;  %v77_v2 = vld [vmem:[%s1462_s1 + $0x1d8] sm:$0xff]  ;;  %v831_v5 = vpack.c.bf16 %v59_v62, %v58_v58  ;;  %v801_v6 = vpack.c.bf16 %v45_v0, %v44_v63  ;;  %v46_v12 = vld [vmem:[%s1462_s1 + $0xe0] sm:$0xff] }
  0x10   :  { %826 = vmatprep.subr.bf16.mxu1 %v825_v46  ;;  %v28_v4 = vld [vmem:[%s1462_s1 + $0x50] sm:$0xff]  ;;  %v29_v7 = vld [vmem:[%s1462_s1 + $0x58] sm:$0xff]  ;;  %v833_v11 = vpack.c.bf16 %v77_v2, %v76_v1  ;;  %v47_v13 = vld [vmem:[%s1462_s1 + $0xe8] sm:$0xff] }
  0x11   :  { %796 = vmatpush3.bf16.msra.mxu0 %v795_v51  ;;  %v60_v8 = vld [vmem:[%s1462_s1 + $0x150] sm:$0xff]  ;;  %v61_v9 = vld [vmem:[%s1462_s1 + $0x158] sm:$0xff]  ;;  %v78_v14 = vld [vmem:[%s1462_s1 + $0x1e0] sm:$0xff]  ;;  %v803_v16 = vpack.c.bf16 %v29_v7, %v28_v4  ;;  %v805_v19 = vpack.c.bf16 %v47_v13, %v46_v12 }
  0x12   :  { %798 = vmatprep.subr.bf16.mxu0 %v797_v55  ;;  %v79_v15 = vld [vmem:[%s1462_s1 + $0x1e8] sm:$0xff]  ;;  %v835_v17 = vpack.c.bf16 %v61_v9, %v60_v8  ;;  %v15_v18 = vld [vmem:[%s1461_s0] sm:$0xff]  ;;  %v48_v27 = vld [vmem:[%s1462_s1 + $0xf0] sm:$0xff] }
  0x13   :  { %828 = vmatpush3.bf16.msra.mxu1 %v827_v54  ;;  %v30_v20 = vld [vmem:[%s1462_s1 + $0x60] sm:$0xff]  ;;  %v31_v21 = vld [vmem:[%s1462_s1 + $0x68] sm:$0xff]  ;;  %v179_v23 = vrot.slane %v15_v18, %v1133_v10  ;;  %v172_v24 = vcombine.high %v15_v18, %v15_v18  ;;  %v837_v25 = vpack.c.bf16 %v79_v15, %v78_v14  ;;  %v49_v28 = vld [vmem:[%s1462_s1 + $0xf8] sm:$0xff] }
  0x14   :  { %830 = vmatprep.subr.bf16.mxu1 %v829_v61  ;;  %v62_v22 = vld [vmem:[%s1462_s1 + $0x160] sm:$0xff]  ;;  %v63_v26 = vld [vmem:[%s1462_s1 + $0x168] sm:$0xff]  ;;  %v80_v29 = vld [vmem:[%s1462_s1 + $0x1f0] sm:$0xff]  ;;  %v807_v33 = vpack.c.bf16 %v31_v21, %v30_v20  ;;  %v809_v35 = vpack.c.bf16 %v49_v28, %v48_v27 }
  0x15   :  { %800 = vmatpush3.bf16.msra.mxu0 %v799_v3  ;;  %v81_v30 = vld [vmem:[%s1462_s1 + $0x1f8] sm:$0xff]  ;;  %v187_v31 = vcombine.high %v179_v23, %v179_v23  ;;  %v186_v32 = vrot.slane %v172_v24, %v1133_v10  ;;  %v839_v34 = vpack.c.bf16 %v63_v26, %v62_v22  ;;  %v32_v36 = vld [vmem:[%s1462_s1 + $0x70] sm:$0xff]  ;;  %v98_v42 = vld [vmem:[%s1462_s1 + $0x280] sm:$0xff] }
  0x16   :  { %802 = vmatprep.subr.bf16.mxu0 %v801_v6  ;;  %v33_v37 = vld [vmem:[%s1462_s1 + $0x78] sm:$0xff]  ;;  %v64_v38 = vld [vmem:[%s1462_s1 + $0x170] sm:$0xff]  ;;  %v841_v40 = vpack.c.bf16 %v81_v30, %v80_v29  ;;  %v99_v43 = vld [vmem:[%s1462_s1 + $0x288] sm:$0xff] }
  0x17   :  { %832 = vmatpush3.bf16.msra.mxu1 %v831_v5  ;;  %v188_v39 = vcombine.high %v186_v32, %v186_v32  ;;  %286 = vmatprep.mubr.f32.mxu0 %v187_v31  ;;  %v65_v41 = vld [vmem:[%s1462_s1 + $0x178] sm:$0xff]  ;;  %v130_v44 = vld [vmem:[%s1462_s1 + $0x380] sm:$0xff]  ;;  %v131_v45 = vld [vmem:[%s1462_s1 + $0x388] sm:$0xff]  ;;  %v811_v46 = vpack.c.bf16 %v33_v37, %v32_v36  ;;  %v845_v48 = vpack.c.bf16 %v99_v43, %v98_v42 }
  0x18   :  { %834 = vmatprep.subr.bf16.mxu1 %v833_v11  ;;  %v843_v47 = vpack.c.bf16 %v65_v41, %v64_v38  ;;  %v82_v49 = vld [vmem:[%s1462_s1 + $0x200] sm:$0xff]  ;;  %v83_v50 = vld [vmem:[%s1462_s1 + $0x208] sm:$0xff]  ;;  %v877_v52 = vpack.c.bf16 %v131_v45, %v130_v44  ;;  %v100_v54 = vld [vmem:[%s1462_s1 + $0x290] sm:$0xff] }
  0x19   :  { %804 = vmatpush3.bf16.msra.mxu0 %v803_v16  ;;  %356 = vmatprep.mubr.f32.mxu1 %v188_v39  ;;  %v114_v51 = vld [vmem:[%s1462_s1 + $0x300] sm:$0xff]  ;;  %v115_v53 = vld [vmem:[%s1462_s1 + $0x308] sm:$0xff]  ;;  %v101_v55 = vld [vmem:[%s1462_s1 + $0x298] sm:$0xff]  ;;  %v847_v58 = vpack.c.bf16 %v83_v50, %v82_v49 }
  0x1a   :  { %806 = vmatprep.subr.bf16.mxu0 %v805_v19  ;;  %v132_v56 = vld [vmem:[%s1462_s1 + $0x390] sm:$0xff]  ;;  %v133_v57 = vld [vmem:[%s1462_s1 + $0x398] sm:$0xff]  ;;  %v879_v59 = vpack.c.bf16 %v115_v53, %v114_v51  ;;  %v849_v60 = vpack.c.bf16 %v101_v55, %v100_v54  ;;  %v102_v2 = vld [vmem:[%s1462_s1 + $0x2a0] sm:$0xff] }
  0x1b   :  { %836 = vmatpush3.bf16.msra.mxu1 %v835_v17  ;;  %v84_v61 = vld [vmem:[%s1462_s1 + $0x210] sm:$0xff]  ;;  %v85_v62 = vld [vmem:[%s1462_s1 + $0x218] sm:$0xff]  ;;  %v881_v0 = vpack.c.bf16 %v133_v57, %v132_v56  ;;  %v103_v3 = vld [vmem:[%s1462_s1 + $0x2a8] sm:$0xff] }
  0x1c   :  { %838 = vmatprep.subr.bf16.mxu1 %v837_v25  ;;  %v116_v63 = vld [vmem:[%s1462_s1 + $0x310] sm:$0xff]  ;;  %v117_v1 = vld [vmem:[%s1462_s1 + $0x318] sm:$0xff]  ;;  %v134_v4 = vld [vmem:[%s1462_s1 + $0x3a0] sm:$0xff]  ;;  %v851_v6 = vpack.c.bf16 %v85_v62, %v84_v61  ;;  %v853_v8 = vpack.c.bf16 %v103_v3, %v102_v2 }
  0x1d   :  { %808 = vmatpush3.bf16.msra.mxu0 %v807_v33  ;;  %v135_v5 = vld [vmem:[%s1462_s1 + $0x3a8] sm:$0xff]  ;;  %v883_v7 = vpack.c.bf16 %v117_v1, %v116_v63  ;;  %v86_v9 = vld [vmem:[%s1462_s1 + $0x220] sm:$0xff]  ;;  %v104_v15 = vld [vmem:[%s1462_s1 + $0x2b0] sm:$0xff] }
  0x1e   :  { %810 = vmatprep.subr.bf16.mxu0 %v809_v35  ;;  %v87_v11 = vld [vmem:[%s1462_s1 + $0x228] sm:$0xff]  ;;  %v118_v12 = vld [vmem:[%s1462_s1 + $0x320] sm:$0xff]  ;;  %v885_v13 = vpack.c.bf16 %v135_v5, %v134_v4  ;;  %v105_v16 = vld [vmem:[%s1462_s1 + $0x2b8] sm:$0xff] }
  0x1f   :  { %840 = vmatpush3.bf16.msra.mxu1 %v839_v34  ;;  %v119_v14 = vld [vmem:[%s1462_s1 + $0x328] sm:$0xff]  ;;  %v136_v17 = vld [vmem:[%s1462_s1 + $0x3b0] sm:$0xff]  ;;  %v137_v18 = vld [vmem:[%s1462_s1 + $0x3b8] sm:$0xff]  ;;  %v855_v19 = vpack.c.bf16 %v87_v11, %v86_v9  ;;  %v857_v22 = vpack.c.bf16 %v105_v16, %v104_v15 }
  0x20   :  { %842 = vmatprep.subr.bf16.mxu1 %v841_v40  ;;  %v88_v20 = vld [vmem:[%s1462_s1 + $0x230] sm:$0xff]  ;;  %v887_v21 = vpack.c.bf16 %v119_v14, %v118_v12  ;;  %v121_v25 = vld [vmem:[%s1462_s1 + $0x338] sm:$0xff]  ;;  %v889_v26 = vpack.c.bf16 %v137_v18, %v136_v17  ;;  %v106_v27 = vld [vmem:[%s1462_s1 + $0x2c0] sm:$0xff] }
  0x21   :  { %812 = vmatpush3.bf16.msra.mxu0 %v811_v46  ;;  %v120_v24 = vld [vmem:[%s1462_s1 + $0x330] sm:$0xff]  ;;  %v107_v28 = vld [vmem:[%s1462_s1 + $0x2c8] sm:$0xff]  ;;  %v138_v30 = vld [vmem:[%s1462_s1 + $0x3c0] sm:$0xff] }
  0x22   :  { %846 = vmatprep.subr.bf16.mxu0 %v845_v48  ;;  %v16_v29 = vld [vmem:[%s1461_s0 + $0x8] sm:$0xff]  ;;  %v891_v35 = vpack.c.bf16 %v121_v25, %v120_v24  ;;  %v861_v36 = vpack.c.bf16 %v107_v28, %v106_v27  ;;  %v90_v37 = vld [vmem:[%s1462_s1 + $0x240] sm:$0xff]  ;;  %v108_v44 = vld [vmem:[%s1462_s1 + $0x2d0] sm:$0xff] }
  0x23   :  { %844 = vmatpush3.bf16.msra.mxu1 %v843_v47  ;;  %v139_v31 = vld [vmem:[%s1462_s1 + $0x3c8] sm:$0xff]  ;;  %v189_v33 = vcombine.high %v16_v29, %v16_v29  ;;  %v122_v39 = vld [vmem:[%s1462_s1 + $0x340] sm:$0xff]  ;;  %v109_v45 = vld [vmem:[%s1462_s1 + $0x2d8] sm:$0xff] }
  0x24   :  { %878 = vmatprep.subr.bf16.mxu1 %v877_v52  ;;  %287 = vmatmul.mubr.f32.vlgmr.msra.gmra.mrb[0].mxu0 %v179_v23  ;;  %v89_v23 = vld [vmem:[%s1462_s1 + $0x238] sm:$0xff]  ;;  %v91_v38 = vld [vmem:[%s1462_s1 + $0x248] sm:$0xff]  ;;  %v893_v42 = vpack.c.bf16 %v139_v31, %v138_v30  ;;  %v140_v46 = vld [vmem:[%s1462_s1 + $0x3d0] sm:$0xff]  ;;  %v865_v51 = vpack.c.bf16 %v109_v45, %v108_v44 }
  0x25   :  { %848 = vmatpush3.bf16.msra.mxu0 %v847_v58  ;;  %v859_v34 = vpack.c.bf16 %v89_v23, %v88_v20  ;;  %v1314_v41 = vrot.slane %v189_v33, %v1133_v10  ;;  %v123_v43 = vld [vmem:[%s1462_s1 + $0x348] sm:$0xff]  ;;  %v863_v48 = vpack.c.bf16 %v91_v38, %v90_v37  ;;  %v92_v49 = vld [vmem:[%s1462_s1 + $0x250] sm:$0xff]  ;;  %v93_v52 = vld [vmem:[%s1462_s1 + $0x258] sm:$0xff] }
  0x26   :  { %357 = vmatmul.mubr.f32.vlgmr.msra.gmra.mrb[0].mxu1 %v186_v32  ;;  %850 = vmatprep.subr.bf16.mxu0 %v849_v60  ;;  %v1300_v32 = vrot.slane %v16_v29, %v1133_v10  ;;  %v141_v10 = vld [vmem:[%s1462_s1 + $0x3d8] sm:$0xff]  ;;  %v895_v50 = vpack.c.bf16 %v123_v43, %v122_v39  ;;  %v124_v53 = vld [vmem:[%s1462_s1 + $0x350] sm:$0xff] }
  0x27   :  { %880 = vmatpush3.bf16.msra.mxu1 %v879_v59  ;;  %v205_v47 = vcombine.high %v1314_v41, %v1314_v41 }
  0x28   :  { %882 = vmatprep.subr.bf16.mxu1 %v881_v0  ;;  %v204_v40 = vcombine.high %v1300_v32, %v1300_v32 }
  0x29   :  { %852 = vmatpush3.bf16.msra.mxu0 %v851_v6 }
  0x2a   :  { %854 = vmatprep.subr.bf16.mxu0 %v853_v8  ;;  %426 = vmatprep.mubr.f32.mxu0 %v204_v40 }
  0x2b   :  { %884 = vmatpush3.bf16.msra.mxu1 %v883_v7 }
  0x2c   :  { %886 = vmatprep.subr.bf16.mxu1 %v885_v13 }
  0x2d   :  { %856 = vmatpush3.bf16.msra.mxu0 %v855_v19 }
  0x2e   :  { %858 = vmatprep.subr.bf16.mxu0 %v857_v22 }
  0x2f   :  { %888 = vmatpush3.bf16.msra.mxu1 %v887_v21 }
  0x30   :  { %890 = vmatprep.subr.bf16.mxu1 %v889_v26 }
  0x31   :  { %860 = vmatpush3.bf16.msra.mxu0 %v859_v34 }
  0x32   :  { %862 = vmatprep.subr.bf16.mxu0 %v861_v36 }
  0x33   :  { %892 = vmatpush3.bf16.msra.mxu1 %v891_v35 }
  0x34   :  { %8 = vsyncpa [#allocation3], 0  ;;  %894 = vmatprep.subr.bf16.mxu1 %v893_v42  ;;  %v897_v54 = vpack.c.bf16 %v141_v10, %v140_v46  ;;  %v125_v55 = vld [vmem:[%s1462_s1 + $0x358] sm:$0xff]  ;;  %v110_v56 = vld [vmem:[%s1462_s1 + $0x2e0] sm:$0xff]  ;;  %496 = vmatprep.mubr.f32.mxu1 %v205_v47  ;;  %v867_v60 = vpack.c.bf16 %v93_v52, %v92_v49  ;;  %v965_v22 = vmov 0.0|0.0   ;;  %vm966_vm0 = vmmov 0  }
  0x35   :  { %v111_v57 = vld [vmem:[%s1462_s1 + $0x2e8] sm:$0xff]  ;;  %v142_v58 = vld [vmem:[%s1462_s1 + $0x3e0] sm:$0xff]  ;;  %864 = vmatpush3.bf16.msra.mxu0 %v863_v48  ;;  %v899_v61 = vpack.c.bf16 %v125_v55, %v124_v53  ;;  %v112_v4 = vld [vmem:[%s1462_s1 + $0x2f0] sm:$0xff]  ;;  %v967_v28 = vmov 0.0  }
  0x36   :  { %v143_v59 = vld [vmem:[%s1462_s1 + $0x3e8] sm:$0xff]  ;;  %866 = vmatprep.subr.bf16.mxu0 %v865_v51  ;;  %v869_v62 = vpack.c.bf16 %v111_v57, %v110_v56  ;;  %v94_v63 = vld [vmem:[%s1462_s1 + $0x260] sm:$0xff]  ;;  %v113_v5 = vld [vmem:[%s1462_s1 + $0x2f8] sm:$0xff] }
  0x37   :  { %896 = vmatpush3.bf16.msra.mxu1 %v895_v50  ;;  %v95_v0 = vld [vmem:[%s1462_s1 + $0x268] sm:$0xff]  ;;  %v126_v1 = vld [vmem:[%s1462_s1 + $0x360] sm:$0xff]  ;;  %v901_v2 = vpack.c.bf16 %v143_v59, %v142_v58  ;;  %v144_v6 = vld [vmem:[%s1462_s1 + $0x3f0] sm:$0xff]  ;;  %v873_v11 = vpack.c.bf16 %v113_v5, %v112_v4 }
  0x38   :  { %898 = vmatprep.subr.bf16.mxu1 %v897_v54  ;;  %v127_v3 = vld [vmem:[%s1462_s1 + $0x368] sm:$0xff]  ;;  %v145_v7 = vld [vmem:[%s1462_s1 + $0x3f8] sm:$0xff]  ;;  %v871_v8 = vpack.c.bf16 %v95_v0, %v94_v63  ;;  %v96_v12 = vld [vmem:[%s1462_s1 + $0x270] sm:$0xff] }
  0x39   :  { %868 = vmatpush3.bf16.msra.mxu0 %v867_v60  ;;  %v903_v9 = vpack.c.bf16 %v127_v3, %v126_v1  ;;  %v97_v13 = vld [vmem:[%s1462_s1 + $0x278] sm:$0xff]  ;;  %v905_v14 = vpack.c.bf16 %v145_v7, %v144_v6  ;;  %v128_v15 = vld [vmem:[%s1462_s1 + $0x370] sm:$0xff]  ;;  %v146_v19 = vld [vmem:[%s1462_s1 + $0x400] sm:$0xff] }
  0x3a   :  { %870 = vmatprep.subr.bf16.mxu0 %v869_v62  ;;  %v129_v16 = vld [vmem:[%s1462_s1 + $0x378] sm:$0xff]  ;;  %v875_v17 = vpack.c.bf16 %v97_v13, %v96_v12  ;;  %v147_v20 = vld [vmem:[%s1462_s1 + $0x408] sm:$0xff]  ;;  %v148_v23 = vld [vmem:[%s1462_s1 + $0x410] sm:$0xff] }
  0x3b   :  { %900 = vmatpush3.bf16.msra.mxu1 %v899_v61  ;;  %v907_v18 = vpack.c.bf16 %v129_v16, %v128_v15  ;;  %v910_v21 = vpack.c.bf16 %v147_v20, %v146_v19  ;;  %v149_v24 = vld [vmem:[%s1462_s1 + $0x418] sm:$0xff]  ;;  %v150_v26 = vld [vmem:[%s1462_s1 + $0x420] sm:$0xff]  ;;  %v151_v27 = vld [vmem:[%s1462_s1 + $0x428] sm:$0xff] }
  0x3c   :  { %902 = vmatprep.subr.bf16.mxu1 %v901_v2  ;;  %v913_v25 = vpack.c.bf16 %v149_v24, %v148_v23  ;;  %v916_v29 = vpack.c.bf16 %v151_v27, %v150_v26  ;;  %v152_v30 = vld [vmem:[%s1462_s1 + $0x430] sm:$0xff]  ;;  %v153_v31 = vld [vmem:[%s1462_s1 + $0x438] sm:$0xff]  ;;  %v154_v33 = vld [vmem:[%s1462_s1 + $0x440] sm:$0xff] }
  0x3d   :  { %872 = vmatpush3.bf16.msra.mxu0 %v871_v8  ;;  %v155_v34 = vld [vmem:[%s1462_s1 + $0x448] sm:$0xff]  ;;  %v156_v36 = vld [vmem:[%s1462_s1 + $0x450] sm:$0xff]  ;;  %v157_v37 = vld [vmem:[%s1462_s1 + $0x458] sm:$0xff] }
  0x3e   :  { %874 = vmatprep.subr.bf16.mxu0 %v873_v11  ;;  %v922_v35 = vpack.c.bf16 %v155_v34, %v154_v33  ;;  %v925_v38 = vpack.c.bf16 %v157_v37, %v156_v36  ;;  %v158_v39 = vld [vmem:[%s1462_s1 + $0x460] sm:$0xff]  ;;  %v159_v40 = vld [vmem:[%s1462_s1 + $0x468] sm:$0xff]  ;;  %v160_v42 = vld [vmem:[%s1462_s1 + $0x470] sm:$0xff] }
  0x3f   :  { %904 = vmatpush3.bf16.msra.mxu1 %v903_v9  ;;  %v161_v43 = vld [vmem:[%s1462_s1 + $0x478] sm:$0xff]  ;;  %v588_v45 = vld.sshfl [vmem:[%s1461_s0 + $0x10] sm:$0x3 pattern:$0x76325410]  ;;  %s968_s0 = smov [#allocation2]  }
  0x40   :  { %906 = vmatprep.subr.bf16.mxu1 %v905_v14  ;;  %v931_v44 = vpack.c.bf16 %v161_v43, %v160_v42  ;;  %v587_v10 = vld [vmem:[%s1463_s2] ss:$0 sm:$0xff]  ;;  %s579_s1 = sshll.u32 %s968_s0, 4  ;;  %s580_s1 = int_to_ptr.vmem [resolvable:$true] %s579_s1 }
  0x41   :  { %876 = vmatpush3.bf16.msra.mxu0 %v875_v17  ;;  %s940_s2 = scalar_lea.vmem %s580_s1, 32  ;;  %p945_p1 = scmp.lt.s32.totalorder %s580_s1, %s580_s1 }
  0x42   :  { %909 = vmatprep.subr.bf16.mxu0 %v965_v22  ;;  %p941_p0 = scmp.ne.s32.totalorder %s580_s1, %s940_s2  ;;  %p946_p2 = scmp.lt.s32.totalorder %s940_s2, %s940_s2 }
  0x43   :  { %908 = vmatpush3.bf16.msra.mxu1 %v907_v18 }
  0x44   :  { %427 = vmatmul.mubr.f32.vlgmr.msra.gmra.mrb[2].mxu0 %v1300_v32  ;;  %v919_v32 = vpack.c.bf16 %v153_v31, %v152_v30  ;;  %p947_p3 = por %p946_p2, %p945_p1 }
  0x45   :  { %911 = vmatpush3.bf16.msra.mxu0 %v910_v21  ;;  %778 = vmatprep.mubr.msk.f32.mxu0 %vm966_vm0, %v967_v28 }
  0x46   :  { %497 = vmatmul.mubr.f32.vlgmr.msra.gmra.mrb[2].mxu1 %v1314_v41  ;;  %912 = vmatprep.subr.bf16.mxu0 %v965_v22  ;;  %v928_v41 = vpack.c.bf16 %v159_v40, %v158_v39  ;;  %p948_p4 = pnand %p947_p3, %p941_p0 }
  0x49   :  { %914 = vmatpush3.bf16.msra.mxu0 %v913_v25 }
  0x4a   :  { %915 = vmatprep.subr.bf16.mxu0 %v965_v22 }
  0x4d   :  { %917 = vmatpush3.bf16.msra.mxu0 %v916_v29 }
  0x4e   :  { %918 = vmatprep.subr.bf16.mxu0 %v965_v22 }
  0x51   :  { %920 = vmatpush3.bf16.msra.mxu0 %v919_v32 }
  0x52   :  { %921 = vmatprep.subr.bf16.mxu0 %v965_v22 }
  0x55   :  { %923 = vmatpush3.bf16.msra.mxu0 %v922_v35 }
  0x56   :  { %924 = vmatprep.subr.bf16.mxu0 %v965_v22 }
  0x59   :  { %926 = vmatpush3.bf16.msra.mxu0 %v925_v38 }
  0x5a   :  { %927 = vmatprep.subr.bf16.mxu0 %v965_v22 }
  0x5d   :  { %929 = vmatpush3.bf16.msra.mxu0 %v928_v41 }
  0x5e   :  { %930 = vmatprep.subr.bf16.mxu0 %v965_v22 }
  0x61   :  { %932 = vmatpush3.bf16.msra.mxu0 %v931_v44 }
  0x64   :  { %779 = vmatmul.mubr.f32.vlgmr.msra.gmra.mrb[4].mxu0 %v588_v45 }
  0xf7   :  { %v621_v46 = vpop.f32.mrb[0].mxu0 }
  0xf8   :  { %v622_v47 = vpop.f32.mrb[1].mxu0 }
  0xf9   :  { %v656_v48 = vpop.f32.mrb[0].mxu1  ;;  %v623_v49 = vadd.f32 %v622_v47, %v621_v46 }
  0xfa   :  { %v657_v50 = vpop.f32.mrb[1].mxu1 }
  0xfb   :  { %v658_v51 = vadd.f32 %v657_v50, %v656_v48  ;;  %v289_v52 = vadd.f32 %v623_v49, %v587_v10 }
  0xfd   :  { %v359_v53 = vadd.f32 %v658_v51, %v289_v52 }
 0x117   :  { %v691_v54 = vpop.f32.mrb[2].mxu0 }
 0x118   :  { %v692_v55 = vpop.f32.mrb[3].mxu0 }
 0x119   :  { %v726_v56 = vpop.f32.mrb[2].mxu1  ;;  %v693_v57 = vadd.f32 %v692_v55, %v691_v54 }
 0x11a   :  { %v727_v58 = vpop.f32.mrb[3].mxu1 }
 0x11b   :  { %v728_v59 = vadd.f32 %v727_v58, %v726_v56  ;;  %v429_v60 = vadd.f32 %v693_v57, %v359_v53 }
 0x11d   :  { %v499_v61 = vadd.f32 %v728_v59, %v429_v60 }
 0x137   :  { %v568_v62 = vpop.f32.mrb[4].mxu0 }
 0x138   :  { %v569_v63 = vadd.f32 %v568_v62, %v499_v61  ;;  %v780_v0 = vpop.f32.mrb[5].mxu0 }
 0x13a   :  { %572 = vst [vmem:[#allocation2] sm:$0x3] %v569_v63 }
 0x13b   :  { %951 = shalt.err (!%p948_p4)
}
 0x13c   :  { %s952_s13 = scalar_lea.hbm %s1464_s3, 32 }
 0x13d   :  { %p953_p5 = scmp.ne.s32.totalorder %s1464_s3, %s952_s13  ;;  %p956_p6 = scmp.lt.u32.totalorder %s952_s13, %s1464_s3 }
 0x13f   :  { %p958_p7 = pnand %p956_p6, %p953_p5 }
 0x141   :  { %961 = shalt.err (!%p958_p7)
}
 0x142   :  { %582 = dma.vmem_to_hbm [thread:$0]  %s580_s1, 32, %s1464_s3, [#allocation3]  }
 0x143   :  { %962 = dma.done.wait [#allocation3], 32  }
 0x144   :  { %963 = vsyncadd [#allocation3], 4294967264 }
 0x145   :  { %586 = vsyncpa [#allocation3], 1 }

</bundles_post_ra>
